<compile_context>
chip_gen: v6e
topology: v6e:2x2x1
jax: 0.10.0
libtpu: 0.0.40
codegen_flags: <defaults>
</compile_context>

<pallas_src>
import jax
import jax.numpy as jnp
from jax.experimental import pallas as pl
from jax.experimental.pallas import tpu as pltpu

hidden_size = 32
n_features = 1
input_size = n_features
output_size = 1


def rnn_kernel(x_ref, p_ref, out_ref):
    # x_ref: (B, T, 1)  batch-first input, exactly as PyTorch hands it over.
    # p_ref: (H+8, H)   packed parameter slab:
    #   rows [0:H]   -> W_hh^T            (in, out) orientation
    #   row  H       -> W_ih^T row        (I == 1)
    #   row  H+1     -> merged bias       (b_ih + b_hh)
    #   row  H+2     -> W_fc row          (O == 1)
    #   row  H+3     -> b_fc in column 0  (rest zero padding)
    #   rows H+4..   -> zero padding (sublane alignment)
    # out_ref: (B, 1)
    B, T, _ = x_ref.shape
    H = p_ref.shape[1]

    whh = p_ref[0:H, :]              # (H, H)
    wih = p_ref[H:H + 1, :]          # (1, H)
    b = p_ref[H + 1:H + 2, :]        # (1, H)
    wfc = p_ref[H + 2:H + 3, :]      # (1, H)
    bfc = p_ref[H + 3:H + 4, 0:1]    # (1, 1)

    x = x_ref[...]                   # (B, T, 1)

    # Input projection + bias for ALL time steps at once.  I == 1, so this is
    # an outer product on the VPU (lane-broadcast of wih), no MXU push.
    pre = x * wih[None, :, :] + b[None, :, :]            # (B, T, H)

    # h0 == 0  =>  first step needs no hidden matmul.
    h = jnp.tanh(pre[:, 0, :])                           # (B, H)

    # Fully unrolled recurrence (T is static and small): only the W_hh matmul
    # is on the serial critical path.
    for t in range(1, T):
        h = jnp.tanh(pre[:, t, :] +
                     jnp.dot(h, whh, preferred_element_type=jnp.float32))

    # Final Linear with O == 1: VPU multiply + lane reduction (no MXU).
    # NOTE: output stays (B, 1); make it lane-dense only once B grows.
    out_ref[...] = jnp.sum(h * wfc, axis=-1, keepdims=True) + bfc


def prepare_params(w_ih, w_hh, b_ih, b_hh, w_fc, b_fc):
    """One-time (parameter-load-time) packing of all weights into one slab."""
    H = w_hh.shape[0]
    slab = jnp.zeros((H + 8, H), jnp.float32)
    slab = slab.at[0:H, :].set(jnp.transpose(w_hh).astype(jnp.float32))   # W_hh^T
    slab = slab.at[H, :].set(w_ih[:, 0].astype(jnp.float32))              # W_ih^T row
    slab = slab.at[H + 1, :].set((b_ih + b_hh).astype(jnp.float32))       # merged bias
    slab = slab.at[H + 2, :].set(w_fc[0, :].astype(jnp.float32))          # W_fc row
    slab = slab.at[H + 3, 0].set(b_fc[0].astype(jnp.float32))             # b_fc
    return slab


@jax.jit
def rnn_model_forward(x, params_slab):
    """x: (B, T, I) batch-first f32, I == 1.  Returns (B, 1)."""
    B, T, I = x.shape
    assert I == 1, "kernel is specialized for input_size == 1"
    assert T >= 1
    vmem = pl.BlockSpec(memory_space=pltpu.MemorySpace.VMEM)
    return pl.pallas_call(
        rnn_kernel,
        out_shape=jax.ShapeDtypeStruct((B, output_size), jnp.float32),
        in_specs=[vmem, vmem],
        out_specs=vmem,
    )(x, params_slab)


def rnn_model_reference(x, w_ih, w_hh, b_ih, b_hh, w_fc, b_fc):
    """Pure-JAX reference matching nn.RNN(batch_first=True) + Linear."""
    B, T, I = x.shape
    H = w_hh.shape[0]
    h = jnp.zeros((B, H), jnp.float32)
    for t in range(T):
        h = jnp.tanh(x[:, t, :] @ w_ih.T + b_ih +
                     jnp.dot(h, w_hh.T, preferred_element_type=jnp.float32) + b_hh)
    return h @ w_fc.T + b_fc


if __name__ == "__main__":
    key = jax.random.PRNGKey(0)
    k_x, k1, k2, k3, k4, k5, k6 = jax.random.split(key, 7)

    batch, seq = 2, 8
    bound = 1.0 / jnp.sqrt(hidden_size)  # PyTorch nn.RNN init bound

    # Parameters (deterministic synthetic init, PyTorch shapes).
    w_ih = jax.random.uniform(k1, (hidden_size, input_size), jnp.float32, -bound, bound)
    w_hh = jax.random.uniform(k2, (hidden_size, hidden_size), jnp.float32, -bound, bound)
    b_ih = jax.random.uniform(k3, (hidden_size,), jnp.float32, -bound, bound)
    b_hh = jax.random.uniform(k4, (hidden_size,), jnp.float32, -bound, bound)
    w_fc = jax.random.uniform(k5, (output_size, hidden_size), jnp.float32, -bound, bound)
    b_fc = jax.random.uniform(k6, (output_size,), jnp.float32, -bound, bound)

    # Input: (batch, seq, n_features), batch_first like PyTorch.
    x = jax.random.normal(k_x, (batch, seq, input_size), jnp.float32)

    # One-time parameter packing (hoisted out of the per-call path).
    params_slab = jax.block_until_ready(
        prepare_params(w_ih, w_hh, b_ih, b_hh, w_fc, b_fc))

    out = rnn_model_forward(x, params_slab)
    out = jax.block_until_ready(out)

    ref = rnn_model_reference(x, w_ih, w_hh, b_ih, b_hh, w_fc, b_fc)
    assert out.shape == (batch, output_size), out.shape
    assert jnp.allclose(out, ref, atol=1e-5, rtol=1e-5), (out, ref)

    print("KERNEL_OK")
</pallas_src>

<mosaic_0001>
module attributes {stable_mosaic.version = 11 : i64} {
  func.func @rnn_kernel(%arg0: memref<2x8x1xf32, #tpu.memory_space<vmem>>, %arg1: memref<40x32xf32, #tpu.memory_space<vmem>>, %arg2: memref<2x1xf32, #tpu.memory_space<vmem>>) attributes {dimension_semantics = [], scalar_prefetch = 0 : i64, scratch_operands = 0 : i64, tpu.core_type = #tpu.core_type<tc>} {
    %c0 = arith.constant 0 : index
    %c0_0 = arith.constant 0 : index
    %0 = vector.load %arg1[%c0, %c0_0] : memref<40x32xf32, #tpu.memory_space<vmem>>, vector<32x32xf32>
    %c32 = arith.constant 32 : index
    %c0_1 = arith.constant 0 : index
    %1 = vector.load %arg1[%c32, %c0_1] : memref<40x32xf32, #tpu.memory_space<vmem>>, vector<1x32xf32>
    %c33 = arith.constant 33 : index
    %c0_2 = arith.constant 0 : index
    %2 = vector.load %arg1[%c33, %c0_2] : memref<40x32xf32, #tpu.memory_space<vmem>>, vector<1x32xf32>
    %c34 = arith.constant 34 : index
    %c0_3 = arith.constant 0 : index
    %3 = vector.load %arg1[%c34, %c0_3] : memref<40x32xf32, #tpu.memory_space<vmem>>, vector<1x32xf32>
    %c35 = arith.constant 35 : index
    %c0_4 = arith.constant 0 : index
    %4 = vector.load %arg1[%c35, %c0_4] : memref<40x32xf32, #tpu.memory_space<vmem>>, vector<1x1xf32>
    %c0_5 = arith.constant 0 : index
    %c0_6 = arith.constant 0 : index
    %c0_7 = arith.constant 0 : index
    %5 = vector.load %arg0[%c0_5, %c0_6, %c0_7] : memref<2x8x1xf32, #tpu.memory_space<vmem>>, vector<2x8x1xf32>
    %6 = vector.shape_cast %1 : vector<1x32xf32> to vector<1x1x32xf32>
    %7 = vector.broadcast %5 : vector<2x8x1xf32> to vector<2x8x32xf32>
    %8 = vector.broadcast %6 : vector<1x1x32xf32> to vector<2x8x32xf32>
    %9 = arith.mulf %7, %8 : vector<2x8x32xf32>
    %10 = vector.shape_cast %2 : vector<1x32xf32> to vector<1x1x32xf32>
    %11 = vector.broadcast %10 : vector<1x1x32xf32> to vector<2x8x32xf32>
    %12 = arith.addf %9, %11 : vector<2x8x32xf32>
    %13 = vector.extract_strided_slice %12 {offsets = [0, 0, 0], sizes = [2, 1, 32], strides = [1, 1, 1]} : vector<2x8x32xf32> to vector<2x1x32xf32>
    %14 = vector.shape_cast %13 : vector<2x1x32xf32> to vector<2x32xf32>
    %15 = math.tanh %14 : vector<2x32xf32>
    %16 = vector.extract_strided_slice %12 {offsets = [0, 1, 0], sizes = [2, 1, 32], strides = [1, 1, 1]} : vector<2x8x32xf32> to vector<2x1x32xf32>
    %17 = vector.shape_cast %16 : vector<2x1x32xf32> to vector<2x32xf32>
    %cst = arith.constant dense<0.000000e+00> : vector<2x32xf32>
    %18 = tpu.matmul %15, %0, %cst {dimension_numbers = #tpu.dot_dimension_numbers<[1], [0], [0], [1], [0, 0, 1, 1], [], []>} : vector<2x32xf32>, vector<32x32xf32>, vector<2x32xf32> -> vector<2x32xf32>
    %19 = arith.addf %17, %18 : vector<2x32xf32>
    %20 = math.tanh %19 : vector<2x32xf32>
    %21 = vector.extract_strided_slice %12 {offsets = [0, 2, 0], sizes = [2, 1, 32], strides = [1, 1, 1]} : vector<2x8x32xf32> to vector<2x1x32xf32>
    %22 = vector.shape_cast %21 : vector<2x1x32xf32> to vector<2x32xf32>
    %cst_8 = arith.constant dense<0.000000e+00> : vector<2x32xf32>
    %23 = tpu.matmul %20, %0, %cst_8 {dimension_numbers = #tpu.dot_dimension_numbers<[1], [0], [0], [1], [0, 0, 1, 1], [], []>} : vector<2x32xf32>, vector<32x32xf32>, vector<2x32xf32> -> vector<2x32xf32>
    %24 = arith.addf %22, %23 : vector<2x32xf32>
    %25 = math.tanh %24 : vector<2x32xf32>
    %26 = vector.extract_strided_slice %12 {offsets = [0, 3, 0], sizes = [2, 1, 32], strides = [1, 1, 1]} : vector<2x8x32xf32> to vector<2x1x32xf32>
    %27 = vector.shape_cast %26 : vector<2x1x32xf32> to vector<2x32xf32>
    %cst_9 = arith.constant dense<0.000000e+00> : vector<2x32xf32>
    %28 = tpu.matmul %25, %0, %cst_9 {dimension_numbers = #tpu.dot_dimension_numbers<[1], [0], [0], [1], [0, 0, 1, 1], [], []>} : vector<2x32xf32>, vector<32x32xf32>, vector<2x32xf32> -> vector<2x32xf32>
    %29 = arith.addf %27, %28 : vector<2x32xf32>
    %30 = math.tanh %29 : vector<2x32xf32>
    %31 = vector.extract_strided_slice %12 {offsets = [0, 4, 0], sizes = [2, 1, 32], strides = [1, 1, 1]} : vector<2x8x32xf32> to vector<2x1x32xf32>
    %32 = vector.shape_cast %31 : vector<2x1x32xf32> to vector<2x32xf32>
    %cst_10 = arith.constant dense<0.000000e+00> : vector<2x32xf32>
    %33 = tpu.matmul %30, %0, %cst_10 {dimension_numbers = #tpu.dot_dimension_numbers<[1], [0], [0], [1], [0, 0, 1, 1], [], []>} : vector<2x32xf32>, vector<32x32xf32>, vector<2x32xf32> -> vector<2x32xf32>
    %34 = arith.addf %32, %33 : vector<2x32xf32>
    %35 = math.tanh %34 : vector<2x32xf32>
    %36 = vector.extract_strided_slice %12 {offsets = [0, 5, 0], sizes = [2, 1, 32], strides = [1, 1, 1]} : vector<2x8x32xf32> to vector<2x1x32xf32>
    %37 = vector.shape_cast %36 : vector<2x1x32xf32> to vector<2x32xf32>
    %cst_11 = arith.constant dense<0.000000e+00> : vector<2x32xf32>
    %38 = tpu.matmul %35, %0, %cst_11 {dimension_numbers = #tpu.dot_dimension_numbers<[1], [0], [0], [1], [0, 0, 1, 1], [], []>} : vector<2x32xf32>, vector<32x32xf32>, vector<2x32xf32> -> vector<2x32xf32>
    %39 = arith.addf %37, %38 : vector<2x32xf32>
    %40 = math.tanh %39 : vector<2x32xf32>
    %41 = vector.extract_strided_slice %12 {offsets = [0, 6, 0], sizes = [2, 1, 32], strides = [1, 1, 1]} : vector<2x8x32xf32> to vector<2x1x32xf32>
    %42 = vector.shape_cast %41 : vector<2x1x32xf32> to vector<2x32xf32>
    %cst_12 = arith.constant dense<0.000000e+00> : vector<2x32xf32>
    %43 = tpu.matmul %40, %0, %cst_12 {dimension_numbers = #tpu.dot_dimension_numbers<[1], [0], [0], [1], [0, 0, 1, 1], [], []>} : vector<2x32xf32>, vector<32x32xf32>, vector<2x32xf32> -> vector<2x32xf32>
    %44 = arith.addf %42, %43 : vector<2x32xf32>
    %45 = math.tanh %44 : vector<2x32xf32>
    %46 = vector.extract_strided_slice %12 {offsets = [0, 7, 0], sizes = [2, 1, 32], strides = [1, 1, 1]} : vector<2x8x32xf32> to vector<2x1x32xf32>
    %47 = vector.shape_cast %46 : vector<2x1x32xf32> to vector<2x32xf32>
    %cst_13 = arith.constant dense<0.000000e+00> : vector<2x32xf32>
    %48 = tpu.matmul %45, %0, %cst_13 {dimension_numbers = #tpu.dot_dimension_numbers<[1], [0], [0], [1], [0, 0, 1, 1], [], []>} : vector<2x32xf32>, vector<32x32xf32>, vector<2x32xf32> -> vector<2x32xf32>
    %49 = arith.addf %47, %48 : vector<2x32xf32>
    %50 = math.tanh %49 : vector<2x32xf32>
    %51 = vector.broadcast %3 : vector<1x32xf32> to vector<2x32xf32>
    %52 = arith.mulf %50, %51 : vector<2x32xf32>
    %cst_14 = arith.constant dense<0.000000e+00> : vector<2xf32>
    %53 = vector.multi_reduction <add>, %52, %cst_14 [1] : vector<2x32xf32> to vector<2xf32>
    %54 = vector.shape_cast %53 : vector<2xf32> to vector<2x1xf32>
    %55 = vector.broadcast %4 : vector<1x1xf32> to vector<2x1xf32>
    %56 = arith.addf %54, %55 : vector<2x1xf32>
    %c0_15 = arith.constant 0 : index
    %c0_16 = arith.constant 0 : index
    %57 = vector.load %arg2[%c0_15, %c0_16] : memref<2x1xf32, #tpu.memory_space<vmem>>, vector<2x1xf32>
    tpu.vector_store %arg2[%c0_15, %c0_16], %56 {strides = array<i32>} : memref<2x1xf32, #tpu.memory_space<vmem>>, vector<2x1xf32>,
    return
  }
}

</mosaic_0001>

<bundles_post_ra>
// kernel: rnn_model_forward.1
= control target key start
LH: loop header
LB: loop body
LE: loop exit
PB: predicated region body
PF: predicated region fallthrough
CT: control target
= control target key end

     0   :  { %v838_v0 = vmov 0   ;;  %v839_v4 = vmov 0.0   ;;  %vm840_vm0 = vmmov 0   ;;  %vm48_vm1 = vcmask 1041409   ;;  %s1004_s0 = inlined_call_operand.vmem [shape: f32[2,8,1], index: 0, kind: input, shape index: {}]   ;;  %s1005_s1 = inlined_call_operand.vmem [shape: f32[40,32], index: 1, kind: input, shape index: {}]   ;;  %s1006_s2 = inlined_call_operand.vmem [shape: f32[2,1], index: 2, kind: output, shape index: {}]  }
   0x1   :  { %805 = vset.pattern.permute.xlu0 %v838_v0  ;;  %v20_v1 = vld [vmem:[%s1004_s0 + $0x8] sm:$0xff]  ;;  %v19_v2 = vld [vmem:[%s1004_s0] sm:$0xff]  ;;  %v865_v3 = vld [vmem:[%s1005_s1 + $0x18] sm:$0xff]  ;;  %725 = vmatprep.subr.mxu0 %v839_v4  ;;  %vm50_vm2 = vcmask 261120   ;;  %vm657_vm3 = vcmask 261127   ;;  %vm661_vm4 = vcmask 253952  }
   0x2   :  { %28 = vperm.xlu0 %805, %v20_v1   ;;  %v871_v5 = vld [vmem:[%s1005_s1 + $0x10] sm:$0xff]  ;;  %733 = vmatprep.mubr.msk.f32.mxu0 %vm840_vm0, %v839_v4  ;;  %v881_v6 = vld [vmem:[%s1005_s1 + $0x8] sm:$0xff]  ;;  %v890_v7 = vld [vmem:[%s1005_s1] sm:$0xff]  ;;  %vm671_vm5 = vcmask 7175   ;;  %vm673_vm6 = vcmask 0  }
   0x3   :  { %726 = vmatpush3.msra.mxu0 %v865_v3  ;;  %736 = vmatprep.subr.mxu1 %v839_v4  ;;  %v679_v8 = vld [vmem:[%s1005_s1 + $0x20] ss:$0 sm:$0xff]  ;;  %v680_v9 = vld [vmem:[%s1005_s1 + $0x21] ss:$0 sm:$0xff] }
   0x4   :  { %727 = vmatprep.subr.mxu0 %v839_v4  ;;  %737 = vmatpush3.msra.mxu1 %v865_v3 }
   0x5   :  { %728 = vmatpush3.msra.mxu0 %v871_v5  ;;  %738 = vmatprep.subr.mxu1 %v839_v4 }
   0x6   :  { %23 = vperm.xlu0 %805, %v19_v2   ;;  %729 = vmatprep.subr.mxu0 %v839_v4 }
   0x7   :  { %739 = vmatpush3.msra.mxu1 %v871_v5  ;;  %730 = vmatpush3.msra.mxu0 %v881_v6 }
   0x8   :  { %740 = vmatprep.subr.mxu1 %v839_v4  ;;  %731 = vmatprep.subr.mxu0 %v839_v4 }
   0x9   :  { %741 = vmatpush3.msra.mxu1 %v881_v6  ;;  %732 = vmatpush3.msra.mxu0 %v890_v7 }
   0xa   :  { %742 = vmatprep.subr.mxu1 %v839_v4  ;;  %744 = vmatprep.mubr.msk.f32.mxu1 %vm840_vm0, %v839_v4 }
   0xb   :  { %743 = vmatpush3.msra.mxu1 %v890_v7  ;;  %747 = vmatprep.subr.mxu0 %v839_v4 }
   0xc   :  { %758 = vmatprep.subr.mxu1 %v839_v4 }
  0x7d   :  { %v29_v10 = vpop.permute.xlu0 %28 }
  0x7e   :  { %v36_v11 = vmul.f32 %v679_v8, %v29_v10 }
  0x80   :  { %v910_v12 = vadd.f32 %v680_v9, %v36_v11 }
  0x81   :  { %v24_v13 = vpop.permute.xlu0 %23 }
  0x82   :  { %v35_v14 = vmul.f32 %v679_v8, %v24_v13  ;;  %806 = vtanh.f32 %v910_v12 }
  0x84   :  { %v913_v15 = vadd.f32 %v680_v9, %v35_v14 }
  0x86   :  { %808 = vtanh.f32 %v913_v15 }
  0x8f   :  { %v807_v16 = vpop.eup %806 }
  0x90   :  { %v47_v17 = vrot.slane %v807_v16, 7 }
  0x93   :  { %v809_v18 = vpop.eup %808 }
  0x94   :  { %v49_v19 = vsel %vm48_vm1, %v47_v17, %v809_v18 }
  0x95   :  { %734 = vmatmul.mubr.msk.f32.vlgmr.msra.gmra.mxu0 %vm50_vm2, %v49_v19 }
  0x96   :  { %748 = vmatpush3.msra.mxu0 %v865_v3  ;;  %755 = vmatprep.mubr.msk.f32.mxu0 %vm840_vm0, %v839_v4 }
  0x97   :  { %749 = vmatprep.subr.mxu0 %v839_v4 }
  0x98   :  { %750 = vmatpush3.msra.mxu0 %v871_v5 }
  0x99   :  { %751 = vmatprep.subr.mxu0 %v839_v4 }
  0x9a   :  { %752 = vmatpush3.msra.mxu0 %v881_v6 }
  0x9b   :  { %753 = vmatprep.subr.mxu0 %v839_v4 }
  0x9c   :  { %754 = vmatpush3.msra.mxu0 %v890_v7 }
  0x9d   :  { %769 = vmatprep.subr.mxu0 %v839_v4 }
 0x155   :  { %v119_v20 = vpop.f32.mrf.mxu0 }
 0x156   :  { %v124_v21 = vrot.slane %v119_v20, 7  ;;  %v128_v24 = vadd.f32 %v119_v20, %v910_v12 }
 0x157   :  { %v735_v22 = vpop.f32.mrf.mxu0 }
 0x158   :  { %v127_v23 = vadd.f32 %v124_v21, %v913_v15 }
 0x15a   :  { %810 = vtanh.f32 %v127_v23 }
 0x15b   :  { %812 = vtanh.f32 %v128_v24 }
 0x167   :  { %v811_v25 = vpop.eup %810 }
 0x168   :  { %v133_v26 = vrot.slane %v811_v25, 1  ;;  %v813_v27 = vpop.eup %812 }
 0x16a   :  { %v134_v28 = vsel %vm48_vm1, %v813_v27, %v133_v26 }
 0x16b   :  { %745 = vmatmul.mubr.msk.f32.vlgmr.msra.gmra.mxu1 %vm50_vm2, %v134_v28  ;;  %v688_v28 = vld [vmem:[%s1005_s1 + $0x22] ss:$0 sm:$0xff] }
 0x16c   :  { %759 = vmatpush3.msra.mxu1 %v865_v3  ;;  %766 = vmatprep.mubr.msk.f32.mxu1 %vm840_vm0, %v839_v4 }
 0x16d   :  { %760 = vmatprep.subr.mxu1 %v839_v4 }
 0x16e   :  { %761 = vmatpush3.msra.mxu1 %v871_v5 }
 0x16f   :  { %762 = vmatprep.subr.mxu1 %v839_v4 }
 0x170   :  { %763 = vmatpush3.msra.mxu1 %v881_v6 }
 0x171   :  { %764 = vmatprep.subr.mxu1 %v839_v4 }
 0x172   :  { %765 = vmatpush3.msra.mxu1 %v890_v7 }
 0x173   :  { %780 = vmatprep.subr.mxu1 %v839_v4 }
 0x22b   :  { %v203_v29 = vpop.f32.mrf.mxu1 }
 0x22c   :  { %v208_v30 = vrot.slane %v203_v29, 6  ;;  %v209_v31 = vrot.slane %v203_v29, 7 }
 0x22d   :  { %v746_v32 = vpop.f32.mrf.mxu1 }
 0x22e   :  { %v212_v33 = vadd.f32 %v208_v30, %v913_v15  ;;  %v213_v34 = vadd.f32 %v209_v31, %v910_v12 }
 0x230   :  { %814 = vtanh.f32 %v212_v33 }
 0x231   :  { %816 = vtanh.f32 %v213_v34 }
 0x23d   :  { %v815_v35 = vpop.eup %814 }
 0x23e   :  { %v817_v36 = vpop.eup %816  ;;  %v218_v37 = vrot.slane %v815_v35, 2 }
 0x23f   :  { %v219_v38 = vrot.slane %v817_v36, 1 }
 0x241   :  { %v220_v39 = vsel %vm48_vm1, %v219_v38, %v218_v37 }
 0x242   :  { %756 = vmatmul.mubr.msk.f32.vlgmr.msra.gmra.mxu0 %vm50_vm2, %v220_v39 }
 0x243   :  { %770 = vmatpush3.msra.mxu0 %v865_v3  ;;  %777 = vmatprep.mubr.msk.f32.mxu0 %vm840_vm0, %v839_v4 }
 0x244   :  { %771 = vmatprep.subr.mxu0 %v839_v4 }
 0x245   :  { %772 = vmatpush3.msra.mxu0 %v871_v5 }
 0x246   :  { %773 = vmatprep.subr.mxu0 %v839_v4 }
 0x247   :  { %774 = vmatpush3.msra.mxu0 %v881_v6 }
 0x248   :  { %775 = vmatprep.subr.mxu0 %v839_v4 }
 0x249   :  { %776 = vmatpush3.msra.mxu0 %v890_v7 }
 0x24a   :  { %791 = vmatprep.subr.mxu0 %v839_v4 }
 0x302   :  { %v289_v40 = vpop.f32.mrf.mxu0 }
 0x303   :  { %v294_v41 = vrot.slane %v289_v40, 5  ;;  %v295_v42 = vrot.slane %v289_v40, 6 }
 0x304   :  { %v757_v43 = vpop.f32.mrf.mxu0 }
 0x305   :  { %v298_v44 = vadd.f32 %v294_v41, %v913_v15  ;;  %v299_v45 = vadd.f32 %v295_v42, %v910_v12 }
 0x307   :  { %818 = vtanh.f32 %v298_v44 }
 0x308   :  { %820 = vtanh.f32 %v299_v45 }
 0x314   :  { %v819_v46 = vpop.eup %818 }
 0x315   :  { %v821_v47 = vpop.eup %820  ;;  %v304_v48 = vrot.slane %v819_v46, 3 }
 0x316   :  { %v305_v49 = vrot.slane %v821_v47, 2 }
 0x318   :  { %v306_v50 = vsel %vm48_vm1, %v305_v49, %v304_v48 }
 0x319   :  { %767 = vmatmul.mubr.msk.f32.vlgmr.msra.gmra.mxu1 %vm50_vm2, %v306_v50 }
 0x31a   :  { %781 = vmatpush3.msra.mxu1 %v865_v3  ;;  %788 = vmatprep.mubr.msk.f32.mxu1 %vm840_vm0, %v839_v4 }
 0x31b   :  { %782 = vmatprep.subr.mxu1 %v839_v4 }
 0x31c   :  { %783 = vmatpush3.msra.mxu1 %v871_v5 }
 0x31d   :  { %784 = vmatprep.subr.mxu1 %v839_v4 }
 0x31e   :  { %785 = vmatpush3.msra.mxu1 %v881_v6 }
 0x31f   :  { %786 = vmatprep.subr.mxu1 %v839_v4 }
 0x320   :  { %787 = vmatpush3.msra.mxu1 %v890_v7 }
 0x3d9   :  { %v375_v51 = vpop.f32.mrf.mxu1 }
 0x3da   :  { %v380_v52 = vrot.slane %v375_v51, 4  ;;  %v381_v53 = vrot.slane %v375_v51, 5 }
 0x3db   :  { %v768_v54 = vpop.f32.mrf.mxu1 }
 0x3dc   :  { %v384_v55 = vadd.f32 %v380_v52, %v913_v15  ;;  %v385_v56 = vadd.f32 %v381_v53, %v910_v12 }
 0x3de   :  { %822 = vtanh.f32 %v384_v55 }
 0x3df   :  { %824 = vtanh.f32 %v385_v56 }
 0x3eb   :  { %v823_v57 = vpop.eup %822 }
 0x3ec   :  { %v825_v58 = vpop.eup %824  ;;  %v390_v59 = vrot.slane %v823_v57, 4 }
 0x3ed   :  { %v391_v60 = vrot.slane %v825_v58, 3 }
 0x3ef   :  { %v392_v61 = vsel %vm48_vm1, %v391_v60, %v390_v59 }
 0x3f0   :  { %778 = vmatmul.mubr.msk.f32.vlgmr.msra.gmra.mxu0 %vm50_vm2, %v392_v61 }
 0x3f1   :  { %792 = vmatpush3.msra.mxu0 %v865_v3  ;;  %799 = vmatprep.mubr.msk.f32.mxu0 %vm840_vm0, %v839_v4 }
 0x3f2   :  { %793 = vmatprep.subr.mxu0 %v839_v4 }
 0x3f3   :  { %794 = vmatpush3.msra.mxu0 %v871_v5 }
 0x3f4   :  { %795 = vmatprep.subr.mxu0 %v839_v4 }
 0x3f5   :  { %796 = vmatpush3.msra.mxu0 %v881_v6 }
 0x3f6   :  { %797 = vmatprep.subr.mxu0 %v839_v4 }
 0x3f7   :  { %798 = vmatpush3.msra.mxu0 %v890_v7 }
 0x4b0   :  { %v461_v62 = vpop.f32.mrf.mxu0 }
 0x4b1   :  { %v466_v63 = vrot.slane %v461_v62, 3  ;;  %v467_v0 = vrot.slane %v461_v62, 4 }
 0x4b2   :  { %v779_v1 = vpop.f32.mrf.mxu0 }
 0x4b3   :  { %v470_v2 = vadd.f32 %v466_v63, %v913_v15  ;;  %v471_v3 = vadd.f32 %v467_v0, %v910_v12 }
 0x4b5   :  { %826 = vtanh.f32 %v470_v2 }
 0x4b6   :  { %828 = vtanh.f32 %v471_v3 }
 0x4c2   :  { %v827_v8 = vpop.eup %826 }
 0x4c3   :  { %v829_v5 = vpop.eup %828  ;;  %v476_v9 = vrot.slane %v827_v8, 5 }
 0x4c4   :  { %v477_v10 = vrot.slane %v829_v5, 4 }
 0x4c6   :  { %v478_v6 = vsel %vm48_vm1, %v477_v10, %v476_v9 }
 0x4c7   :  { %789 = vmatmul.mubr.msk.f32.vlgmr.msra.gmra.mxu1 %vm50_vm2, %v478_v6 }
 0x587   :  { %v547_v4 = vpop.f32.mrf.mxu1 }
 0x588   :  { %v552_v7 = vrot.slane %v547_v4, 2  ;;  %v553_v11 = vrot.slane %v547_v4, 3 }
 0x589   :  { %v790_v13 = vpop.f32.mrf.mxu1 }
 0x58a   :  { %v556_v14 = vadd.f32 %v552_v7, %v913_v15  ;;  %v557_v16 = vadd.f32 %v553_v11, %v910_v12 }
 0x58c   :  { %830 = vtanh.f32 %v556_v14 }
 0x58d   :  { %832 = vtanh.f32 %v557_v16 }
 0x599   :  { %v831_v17 = vpop.eup %830 }
 0x59a   :  { %v833_v18 = vpop.eup %832  ;;  %v562_v19 = vrot.slane %v831_v17, 6 }
 0x59b   :  { %v563_v20 = vrot.slane %v833_v18, 5 }
 0x59d   :  { %v564_v21 = vsel %vm48_vm1, %v563_v20, %v562_v19 }
 0x59e   :  { %800 = vmatmul.mubr.msk.f32.vlgmr.msra.gmra.mxu0 %vm50_vm2, %v564_v21 }
 0x65e   :  { %v633_v22 = vpop.f32.mrf.mxu0 }
 0x65f   :  { %v638_v23 = vrot.slane %v633_v22, 1  ;;  %v639_v24 = vrot.slane %v633_v22, 2 }
 0x660   :  { %v801_v25 = vpop.f32.mrf.mxu0 }
 0x661   :  { %v642_v26 = vadd.f32 %v638_v23, %v913_v15  ;;  %v643_v27 = vadd.f32 %v639_v24, %v910_v12  ;;  %v689_v12 = vld [vmem:[%s1005_s1 + $0x23] ss:$0 sm:$0xff] }
 0x663   :  { %834 = vtanh.f32 %v642_v26 }
 0x664   :  { %836 = vtanh.f32 %v643_v27 }
 0x670   :  { %v835_v29 = vpop.eup %834 }
 0x671   :  { %v837_v30 = vpop.eup %836  ;;  %v650_v31 = vmul.f32 %v835_v29, %v688_v28 }
 0x672   :  { %v651_v32 = vmul.f32 %v837_v30, %v688_v28 }
 0x673   :  { %v658_v33 = vsel %vm657_vm3, %v650_v31, 0.0 }
 0x674   :  { %659 = vadd.xlane.f32.xlu1 %v658_v33  ;;  %v654_v34 = vrot.slane %v651_v32, 7 }
 0x676   :  { %v662_v35 = vsel %vm661_vm4, %v654_v34, 0.0 }
 0x678   :  { %663 = vadd.xlane.f32.xlu1 %v662_v35 }
 0x6fd   :  { %v660_v15 = vpop.xlane.xlu1 %659 }
 0x6fe   :  { %v669_v36 = vadd.f32 %v689_v12, %v660_v15 }
 0x700   :  { %672 = vst.msk [vmem:[%s1006_s2 - $0x7] sm:$0x80] %vm671_vm5, %v669_v36 }
 0x701   :  { %v664_v37 = vpop.xlane.xlu1 %663 }
 0x702   :  { %v670_v38 = vadd.f32 %v689_v12, %v664_v37 }
 0x704   :  { %674 = vst.msk [vmem:[%s1006_s2 + $0x1] sm:$0x1] %vm673_vm6, %v670_v38 }

</bundles_post_ra>
